<compile_context>
chip_gen: v6e
topology: v6e:2x2x1
jax: 0.10.0
libtpu: 0.0.40
codegen_flags: <defaults>
</compile_context>

<pallas_src>
import jax
import jax.numpy as jnp
from jax.experimental import pallas as pl
from jax.experimental.pallas import tpu as pltpu

_VMEM_LIMIT_BYTES = 32 * 1024 * 1024   # explicit scoped-VMEM request (v5e..v7x safe)
_BLOCK_BUDGET_BYTES = 8 * 1024 * 1024  # target live blocks + temporaries per grid step


# --------------------------------------------------------------------------
# kernel A: threshold -> sparse node features + [first, last] interval per C
# --------------------------------------------------------------------------
def _node_interval_kernel(iad_ref, thr_ref, node_ref, s_ref, e_ref):
    x = iad_ref[...]                       # [bb, C, T], input dtype
    thr = thr_ref[...]                     # [C, 1]  (C on sublanes -> broadcast is free)
    mask = x > thr[None, :, :]             # [bb, C, T], compare runs exactly once

    # sparsified IAD / node features (same dtype as input, no upcast)
    node_ref[...] = jnp.where(mask, x, 0)

    T = x.shape[2]
    t = jax.lax.broadcasted_iota(jnp.int32, x.shape, 2)
    s_ref[...] = jnp.min(jnp.where(mask, t, T), axis=2)    # T  if feature never fires
    e_ref[...] = jnp.max(jnp.where(mask, t, -1), axis=2)   # -1 if feature never fires


# --------------------------------------------------------------------------
# kernel B: Allen-style temporal relation codes over a (Ci, Cj) feature tile
#   0 equals, 1 before, 2 meets, 3 overlaps, 4 during, 5 starts, 6 finishes,
#   7 other/inverse, -1 if either interval is empty.
# --------------------------------------------------------------------------
def _relation_kernel(s_i_ref, e_i_ref, s_j_ref, e_j_ref, rel_ref):
    s1 = s_i_ref[...][:, :, None]          # [bb, tc, 1]  (tiny lane->sublane relayout)
    e1 = e_i_ref[...][:, :, None]
    s2 = s_j_ref[...][:, None, :]          # [bb, 1, tc]  (stays lane-dense)
    e2 = e_j_ref[...][:, None, :]

    eq_s = s1 == s2
    eq_e = e1 == e2
    before = e1 < s2
    meets = e1 == s2
    s1_lt_s2 = s1 < s2
    s2_lt_s1 = s2 < s1
    e1_lt_e2 = e1 < e2
    invalid = jnp.minimum(e1, e2) < 0      # empty interval sentinel (e == -1)

    # Later branches only matter where earlier ones were False, so redundant
    # guard terms (e.g. "& ~before" on the overlaps branch) are dropped.
    code = jnp.where(invalid, -1,
           jnp.where(eq_s & eq_e, 0,
           jnp.where(before, 1,
           jnp.where(meets, 2,
           jnp.where(s1_lt_s2 & e1_lt_e2, 3,
           jnp.where(s2_lt_s1 & e1_lt_e2, 4,
           jnp.where(eq_s & e1_lt_e2, 5,
           jnp.where(s2_lt_s1 & eq_e, 6, 7))))))))
    rel_ref[...] = code.astype(rel_ref.dtype)


# --------------------------------------------------------------------------
# block-size selection helpers (VMEM-budget derived, not B//2 heuristics)
# --------------------------------------------------------------------------
def _pick_batch_block(B, per_row_bytes, budget_bytes, align=8):
    # candidate blocks keep sublane-dense rows (multiple of `align`) or span B
    cands = [d for d in range(1, B + 1)
             if B % d == 0 and (d == B or d % align == 0)]
    fit = [d for d in cands if d * per_row_bytes <= budget_bytes]
    if not fit:
        return min(cands)                 # best effort; see T-tiling TODO above
    preferred = [d for d in fit if B // d >= 8]   # keep the DMA pipeline deep
    return max(preferred) if preferred else max(fit)


def _pick_rel_tile(C):
    for tc in (256, 128):                 # lane-dense, bounded [tc, tc] intermediates
        if C % tc == 0:
            return tc
    return C


# --------------------------------------------------------------------------
# wrapper
# --------------------------------------------------------------------------
def temporal_pipeline_forward(iad, thresholds, *, batch_block=None,
                              rel_batch_block=None, rel_tile=None):
    """iad: [B, C, T] float (f32 or bf16), thresholds: [C] float.

    Returns (node_x [B, C, T] (iad dtype),
             edge_idx [2, C*C] int32  -- identical for every batch element,
             edge_attr [B, C*C] int8  -- relation codes in [-1, 7]),
    mirroring the (node_x, edge_idx, edge_attr) tuple of TemporalPipeline.forward.
    Widen edge_attr with .astype(jnp.int32) before embedding-table lookups.
    """
    B, C, T = iad.shape
    dtype = iad.dtype
    thr_col = thresholds.astype(dtype).reshape(C, 1)

    # ---- kernel A: node features + interval extraction (mem-bound) --------
    itemsize = jnp.dtype(dtype).itemsize
    # double-buffered iad+node blocks, ~3 int32 [C,T] temporaries, s/e blocks
    per_row_a = C * T * (4 * itemsize + 12) + 16 * C
    bb_a = batch_block if batch_block is not None else _pick_batch_block(
        B, per_row_a, _BLOCK_BUDGET_BYTES, align=8)
    assert B % bb_a == 0, "batch_block must divide B"

    node_x, s, e = pl.pallas_call(
        _node_interval_kernel,
        out_shape=(jax.ShapeDtypeStruct((B, C, T), dtype),
                   jax.ShapeDtypeStruct((B, C), jnp.int32),
                   jax.ShapeDtypeStruct((B, C), jnp.int32)),
        grid_spec=pltpu.PrefetchScalarGridSpec(
            num_scalar_prefetch=0,
            grid=(B // bb_a,),
            in_specs=[pl.BlockSpec((bb_a, C, T), lambda b: (b, 0, 0)),
                      pl.BlockSpec((C, 1), lambda b: (0, 0))],
            out_specs=[pl.BlockSpec((bb_a, C, T), lambda b: (b, 0, 0)),
                       pl.BlockSpec((bb_a, C), lambda b: (b, 0)),
                       pl.BlockSpec((bb_a, C), lambda b: (b, 0))]),
        compiler_params=pltpu.CompilerParams(
            dimension_semantics=("parallel",),
            vmem_limit_bytes=_VMEM_LIMIT_BYTES),
    )(iad, thr_col)

    # ---- kernel B: C x C relation codes, tiled over (Ci, Cj) (VALU-bound) --
    tc = rel_tile if rel_tile is not None else _pick_rel_tile(C)
    assert C % tc == 0, "rel_tile must divide C"
    # int8 rel tile (x2 buffers) + ~8 int32/bool [tc, tc] temporaries + s/e tiles
    per_row_b = tc * tc * 34 + 32 * tc
    bb_b = rel_batch_block if rel_batch_block is not None else _pick_batch_block(
        B, per_row_b, _BLOCK_BUDGET_BYTES, align=1)
    assert B % bb_b == 0, "rel_batch_block must divide B"

    rel = pl.pallas_call(
        _relation_kernel,
        out_shape=jax.ShapeDtypeStruct((B, C, C), jnp.int8),
        grid_spec=pltpu.PrefetchScalarGridSpec(
            num_scalar_prefetch=0,
            grid=(B // bb_b, C // tc, C // tc),
            in_specs=[pl.BlockSpec((bb_b, tc), lambda b, i, j: (b, i)),
                      pl.BlockSpec((bb_b, tc), lambda b, i, j: (b, i)),
                      pl.BlockSpec((bb_b, tc), lambda b, i, j: (b, j)),
                      pl.BlockSpec((bb_b, tc), lambda b, i, j: (b, j))],
            out_specs=pl.BlockSpec((bb_b, tc, tc), lambda b, i, j: (b, i, j))),
        compiler_params=pltpu.CompilerParams(
            dimension_semantics=("parallel", "parallel", "parallel"),
            vmem_limit_bytes=_VMEM_LIMIT_BYTES),
    )(s, e, s, e)

    edge_attr = rel.reshape(B, C * C)

    # Static dense all-pairs edge index, shared by every batch element (pure
    # glue, no data dependence) -- broadcast at the consumer if a per-batch
    # copy is really required.
    ii = jnp.repeat(jnp.arange(C, dtype=jnp.int32), C)
    jj = jnp.tile(jnp.arange(C, dtype=jnp.int32), C)
    edge_idx = jnp.stack([ii, jj])                    # (2, C*C)

    return node_x, edge_idx, edge_attr


if __name__ == "__main__":
    key = jax.random.PRNGKey(0)
    B, C, T = 2, 8, 16                    # batch, bottleneck_size, num frames
    iad = jax.random.uniform(key, (B, C, T), dtype=jnp.float32)
    # Deterministic per-feature thresholds (stands in for the fitted
    # pipeline's threshold_values).
    thresholds = 0.3 + 0.05 * jnp.arange(C, dtype=jnp.float32)

    node_x, edge_idx, edge_attr = temporal_pipeline_forward(iad, thresholds)
    jax.block_until_ready((node_x, edge_idx, edge_attr))
    print("KERNEL_OK")
</pallas_src>

<mosaic_0001>
module attributes {stable_mosaic.version = 11 : i64} {
  func.func @_node_interval_kernel(%arg0: i32, %arg1: memref<2x8x16xf32, #tpu.memory_space<vmem>>, %arg2: memref<8x1xf32, #tpu.memory_space<vmem>>, %arg3: memref<2x8x16xf32, #tpu.memory_space<vmem>>, %arg4: memref<2x8xi32, #tpu.memory_space<vmem>>, %arg5: memref<2x8xi32, #tpu.memory_space<vmem>>) attributes {dimension_semantics = [#tpu.dimension_semantics<parallel>], iteration_bounds = array<i64: 1>, scalar_prefetch = 0 : i64, scratch_operands = 0 : i64, tpu.core_type = #tpu.core_type<tc>, window_params = [{transform_indices = @transform_0, window_bounds = array<i64: 2, 8, 16>}, {pipeline_mode = #tpu.pipeline_mode<synchronous>, transform_indices = @transform_1, window_bounds = array<i64: 8, 1>}, {transform_indices = @transform_2, window_bounds = array<i64: 2, 8, 16>}, {transform_indices = @transform_3, window_bounds = array<i64: 2, 8>}, {transform_indices = @transform_4, window_bounds = array<i64: 2, 8>}]} {
    %c0 = arith.constant 0 : index
    %c0_0 = arith.constant 0 : index
    %c0_1 = arith.constant 0 : index
    %0 = vector.load %arg1[%c0, %c0_0, %c0_1] : memref<2x8x16xf32, #tpu.memory_space<vmem>>, vector<2x8x16xf32>
    %c0_2 = arith.constant 0 : index
    %c0_3 = arith.constant 0 : index
    %1 = vector.load %arg2[%c0_2, %c0_3] : memref<8x1xf32, #tpu.memory_space<vmem>>, vector<8x1xf32>
    %2 = vector.shape_cast %1 : vector<8x1xf32> to vector<1x8x1xf32>
    %3 = vector.broadcast %2 : vector<1x8x1xf32> to vector<2x8x16xf32>
    %4 = arith.cmpf ogt, %0, %3 : vector<2x8x16xf32>
    %c0_i32 = arith.constant 0 : i32
    %5 = arith.sitofp %c0_i32 : i32 to f32
    %6 = vector.broadcast %5 : f32 to vector<2x8x16xf32>
    %7 = arith.select %4, %0, %6 : vector<2x8x16xi1>, vector<2x8x16xf32>
    %c0_4 = arith.constant 0 : index
    %c0_5 = arith.constant 0 : index
    %c0_6 = arith.constant 0 : index
    %8 = vector.load %arg3[%c0_4, %c0_5, %c0_6] : memref<2x8x16xf32, #tpu.memory_space<vmem>>, vector<2x8x16xf32>
    tpu.vector_store %arg3[%c0_4, %c0_5, %c0_6], %7 {strides = array<i32>} : memref<2x8x16xf32, #tpu.memory_space<vmem>>, vector<2x8x16xf32>,
    %9 = tpu.iota {dimensions = array<i32: 2>} : vector<2x8x16xi32>
    %c16_i32 = arith.constant 16 : i32
    %10 = vector.broadcast %c16_i32 : i32 to vector<2x8x16xi32>
    %11 = arith.select %4, %9, %10 : vector<2x8x16xi1>, vector<2x8x16xi32>
    %cst = arith.constant dense<2147483647> : vector<2x8xi32>
    %12 = vector.multi_reduction <minsi>, %11, %cst [2] : vector<2x8x16xi32> to vector<2x8xi32>
    %c0_7 = arith.constant 0 : index
    %c0_8 = arith.constant 0 : index
    %13 = vector.load %arg4[%c0_7, %c0_8] : memref<2x8xi32, #tpu.memory_space<vmem>>, vector<2x8xi32>
    tpu.vector_store %arg4[%c0_7, %c0_8], %12 {strides = array<i32>} : memref<2x8xi32, #tpu.memory_space<vmem>>, vector<2x8xi32>,
    %c-1_i32 = arith.constant -1 : i32
    %14 = vector.broadcast %c-1_i32 : i32 to vector<2x8x16xi32>
    %15 = arith.select %4, %9, %14 : vector<2x8x16xi1>, vector<2x8x16xi32>
    %cst_9 = arith.constant dense<-2147483648> : vector<2x8xi32>
    %16 = vector.multi_reduction <maxsi>, %15, %cst_9 [2] : vector<2x8x16xi32> to vector<2x8xi32>
    %c0_10 = arith.constant 0 : index
    %c0_11 = arith.constant 0 : index
    %17 = vector.load %arg5[%c0_10, %c0_11] : memref<2x8xi32, #tpu.memory_space<vmem>>, vector<2x8xi32>
    tpu.vector_store %arg5[%c0_10, %c0_11], %16 {strides = array<i32>} : memref<2x8xi32, #tpu.memory_space<vmem>>, vector<2x8xi32>,
    return
  }
  func.func @transform_0(%arg0: i32) -> (i32, i32, i32) {
    %c0_i32 = arith.constant 0 : i32
    %c0_i32_0 = arith.constant 0 : i32
    %c0_i32_1 = arith.constant 0 : i32
    return %arg0, %c0_i32, %c0_i32_0 : i32, i32, i32
  }
  func.func @transform_1(%arg0: i32) -> (i32, i32) {
    %c0_i32 = arith.constant 0 : i32
    %c0_i32_0 = arith.constant 0 : i32
    %c0_i32_1 = arith.constant 0 : i32
    return %c0_i32, %c0_i32_0 : i32, i32
  }
  func.func @transform_2(%arg0: i32) -> (i32, i32, i32) {
    %c0_i32 = arith.constant 0 : i32
    %c0_i32_0 = arith.constant 0 : i32
    %c0_i32_1 = arith.constant 0 : i32
    return %arg0, %c0_i32, %c0_i32_0 : i32, i32, i32
  }
  func.func @transform_3(%arg0: i32) -> (i32, i32) {
    %c0_i32 = arith.constant 0 : i32
    %c0_i32_0 = arith.constant 0 : i32
    return %arg0, %c0_i32 : i32, i32
  }
  func.func @transform_4(%arg0: i32) -> (i32, i32) {
    %c0_i32 = arith.constant 0 : i32
    %c0_i32_0 = arith.constant 0 : i32
    return %arg0, %c0_i32 : i32, i32
  }
}

</mosaic_0001>

<bundles_post_ra>
// kernel: tpu_custom_call.1
= control target key start
LH: loop header
LB: loop body
LE: loop exit
PB: predicated region body
PF: predicated region fallthrough
CT: control target
= control target key end

     0   :  { %10 = vsyncpa [#allocation3], 0  ;;  %s343_s0 = inlined_call_operand.hbm [shape: f32[2,8,16], index: 0, kind: input, shape index: {}]   ;;  %s344_s1 = inlined_call_operand.vmem [shape: f32[8,1], index: 1, kind: input, shape index: {}]   ;;  %s345_s2 = inlined_call_operand.hbm [shape: f32[2,8,16], index: 2, kind: output, shape index: {0}]   ;;  %s346_s3 = inlined_call_operand.hbm [shape: s32[2,8], index: 3, kind: output, shape index: {1}]   ;;  %s347_s4 = inlined_call_operand.hbm [shape: s32[2,8], index: 4, kind: output, shape index: {2}]  }
   0x1   :  { %11 = vsyncpa [#allocation4], 0 }
   0x2   :  { %12 = vsyncpa [#allocation7], 0  ;;  %s271_s15 = smov [#allocation2]  }
   0x3   :  { %s18_s16 = sshll.u32 %s271_s15, 4  ;;  %s19_s16 = int_to_ptr.vmem [resolvable:$true] %s18_s16 }
   0x4   :  { %s193_s17 = scalar_lea.vmem %s19_s16, 256  ;;  %p198_p1 = scmp.lt.s32.totalorder %s19_s16, %s19_s16 }
   0x5   :  { %p194_p0 = scmp.ne.s32.totalorder %s19_s16, %s193_s17  ;;  %p199_p2 = scmp.lt.s32.totalorder %s193_s17, %s193_s17 }
   0x7   :  { %p200_p3 = por %p199_p2, %p198_p1 }
   0x9   :  { %p201_p4 = pnand %p200_p3, %p194_p0 }
   0xb   :  { %204 = shalt.err (!%p201_p4)
}
   0xc   :  { %s272_s18 = smov 128   ;;  %s273_s19 = smov 8  }
   0xd   :  { %24 = dma.hbm_to_vmem [thread:$0]  %s343_s0, 256, %s19_s16, [#allocation3], %s272_s18, %s272_s18, %s273_s19  }
   0xe   :  { %265 = dma.done.wait [#allocation3], 256  }
   0xf   :  { %266 = vsyncadd [#allocation3], 4294967040  ;;  %v274_v0 = vmov 0   ;;  %v32_v1 = vld [vmem:[%s344_s1] sm:$0xff]  ;;  %v45_v2 = vlaneseq  ;;  %v31_v4 = vld [vmem:[#allocation2 + $0x8] sm:$0xff]  ;;  %vm42_vm0 = vcmask 130048  }
  0x10   :  { %184 = vset.pattern.permute.xlu0 %v274_v0  ;;  %v30_v3 = vld [vmem:[#allocation2] sm:$0xff]  ;;  %s275_s0 = smov [#allocation5]  }
  0x11   :  { %35 = vperm.xlu0 %184, %v32_v1   ;;  %v313_v5 = vand.u32 127, %v45_v2  ;;  %s138_s1 = sshll.u32 %s275_s0, 4  ;;  %s139_s1 = int_to_ptr.vmem [resolvable:$true] %s138_s1 }
  0x12   :  { %s205_s24 = scalar_lea.vmem %s139_s1, 256  ;;  %p210_p6 = scmp.lt.s32.totalorder %s139_s1, %s139_s1 }
  0x13   :  { %p206_p5 = scmp.ne.s32.totalorder %s139_s1, %s205_s24  ;;  %p211_p7 = scmp.lt.s32.totalorder %s205_s24, %s205_s24 }
  0x15   :  { %p212_p8 = por %p211_p7, %p210_p6 }
  0x17   :  { %p213_p9 = pnand %p212_p8, %p206_p5 }
  0x8c   :  { %v36_v6 = vpop.permute.xlu0 %35 }
  0x8d   :  { %vm38_vm1 = vcmp.gt.f32.partialorder %v30_v3, %v36_v6  ;;  %vm39_vm2 = vcmp.gt.f32.partialorder %v31_v4, %v36_v6 }
  0x8e   :  { %v40_v7 = vsel %vm38_vm1, %v30_v3, 0.0  ;;  %v41_v8 = vsel %vm39_vm2, %v31_v4, 0.0  ;;  %v48_v9 = vsel %vm39_vm2, %v313_v5, 16  ;;  %v47_v10 = vsel %vm38_vm1, %v313_v5, 16 }
  0x8f   :  { %v64_v11 = vsel %vm42_vm0, %v48_v9, 2147483647  ;;  %43 = vst.msk [vmem:[#allocation5] sm:$0xff] %vm42_vm0, %v40_v7  ;;  %44 = vst.msk [vmem:[#allocation5 + $0x8] sm:$0xff] %vm42_vm0, %v41_v8  ;;  %v49_v12 = vsel %vm42_vm0, %v47_v10, 2147483647 }
  0x90   :  { %v91_v13 = vsel %vm38_vm1, %v313_v5, 4294967295  ;;  %v66_v14 = vshra.s32 %v64_v11, 16  ;;  %v51_v15 = vshra.s32 %v49_v12, 16  ;;  %v92_v17 = vsel %vm39_vm2, %v313_v5, 4294967295 }
  0x91   :  { %v93_v16 = vsel %vm42_vm0, %v91_v13, 2147483648  ;;  %v108_v21 = vsel %vm42_vm0, %v92_v17, 2147483648  ;;  %v50_v25 = vand.u32 65535, %v49_v12  ;;  %v65_v29 = vand.u32 65535, %v64_v11 }
  0x92   :  { %v68_v18 = vcvt.s32.f32 %v66_v14  ;;  %v53_v19 = vcvt.s32.f32 %v51_v15  ;;  %v95_v20 = vshra.s32 %v93_v16, 16  ;;  %v110_v23 = vshra.s32 %v108_v21, 16 }
  0x93   :  { %v52_v28 = vcvt.s32.f32 %v50_v25  ;;  %v67_v32 = vcvt.s32.f32 %v65_v29  ;;  %v94_v33 = vand.u32 65535, %v93_v16  ;;  %v109_v37 = vand.u32 65535, %v108_v21 }
  0x94   :  { %69 = vmin.xlane.f32.xlu1 %v68_v18  ;;  %54 = vmin.xlane.f32.xlu0 %v53_v19  ;;  %v97_v22 = vcvt.s32.f32 %v95_v20  ;;  %v112_v24 = vcvt.s32.f32 %v110_v23 }
  0x95   :  { %v96_v36 = vcvt.s32.f32 %v94_v33  ;;  %v111_v39 = vcvt.s32.f32 %v109_v37 }
  0x98   :  { %98 = vmax.xlane.f32.xlu1 %v97_v22 }
  0x9c   :  { %113 = vmax.xlane.f32.xlu1 %v112_v24 }
 0x11d   :  { %v70_v26 = vpop.xlane.xlu1 %69  ;;  %v55_v27 = vpop.xlane.xlu0 %54 }
 0x11e   :  { %vm56_vm3 = vcmp.eq.f32.partialorder %v53_v19, %v55_v27  ;;  %vm71_vm4 = vcmp.eq.f32.partialorder %v68_v18, %v70_v26 }
 0x11f   :  { %v57_v30 = vsel %vm56_vm3, %v52_v28, inf  ;;  %v72_v34 = vsel %vm71_vm4, %v67_v32, inf }
 0x120   :  { %58 = vmin.xlane.f32.xlu1 %v57_v30 }
 0x121   :  { %v99_v31 = vpop.xlane.xlu1 %98 }
 0x122   :  { %vm100_vm5 = vcmp.eq.f32.partialorder %v97_v22, %v99_v31 }
 0x123   :  { %v101_v38 = vsel %vm100_vm5, %v96_v36, -inf }
 0x124   :  { %73 = vmin.xlane.f32.xlu1 %v72_v34 }
 0x125   :  { %v114_v35 = vpop.xlane.xlu1 %113 }
 0x126   :  { %vm115_vm6 = vcmp.eq.f32.partialorder %v112_v24, %v114_v35 }
 0x127   :  { %v116_v40 = vsel %vm115_vm6, %v111_v39, -inf }
 0x128   :  { %102 = vmax.xlane.f32.xlu1 %v101_v38 }
 0x12c   :  { %117 = vmax.xlane.f32.xlu1 %v116_v40 }
 0x12d   :  { %216 = shalt.err (!%p213_p9)
}
 0x12e   :  { %144 = dma.vmem_to_hbm [thread:$0]  %s139_s1, 256, %s345_s2, [#allocation4], %s272_s18, %s272_s18, %s273_s19   ;;  %v61_v41 = vcvt.f32.s32 %v55_v27  ;;  %v80_v42 = vshrl.u32 %v45_v2, 7  ;;  %v76_v44 = vcvt.f32.s32 %v70_v26  ;;  %v105_v49 = vcvt.f32.s32 %v99_v31 }
 0x12f   :  { %s276_s27 = smov [#allocation6]   ;;  %vm87_vm7 = vcmask 1041409   ;;  %v120_v57 = vcvt.f32.s32 %v114_v35  ;;  %vm89_vm8 = vcmask 58368  }
 0x130   :  { %v62_v45 = vshll.u32 %v61_v41, 16  ;;  %v81_v46 = vsub.s32 %v313_v5, %v80_v42  ;;  %v77_v51 = vshll.u32 %v76_v44, 16  ;;  %s151_s28 = sshll.u32 %s276_s27, 4  ;;  %v106_v55 = vshll.u32 %v105_v49, 16  ;;  %s152_s28 = int_to_ptr.vmem [resolvable:$true] %s151_s28 }
 0x131   :  { %v121_v63 = vshll.u32 %v120_v57, 16  ;;  %s225_s2 = scalar_lea.vmem %s152_s28, 32  ;;  %p230_p11 = scmp.lt.s32.totalorder %s152_s28, %s152_s28 }
 0x132   :  { %p226_p10 = scmp.ne.s32.totalorder %s152_s28, %s225_s2  ;;  %p231_p12 = scmp.lt.s32.totalorder %s225_s2, %s225_s2 }
 0x134   :  { %p232_p13 = por %p231_p12, %p230_p11 }
 0x136   :  { %p233_p0 = pnand %p232_p13, %p226_p10 }
 0x1a9   :  { %v59_v43 = vpop.xlane.xlu1 %58 }
 0x1aa   :  { %v60_v47 = vcvt.f32.s32 %v59_v43 }
 0x1ac   :  { %v63_v48 = vadd.s32 %v62_v45, %v60_v47 }
 0x1ad   :  { %v74_v50 = vpop.xlane.xlu1 %73 }
 0x1ae   :  { %v82_v52 = vrot.slane %v63_v48, %v81_v46  ;;  %v75_v53 = vcvt.f32.s32 %v74_v50 }
 0x1b0   :  { %v78_v54 = vadd.s32 %v77_v51, %v75_v53 }
 0x1b1   :  { %v103_v56 = vpop.xlane.xlu1 %102 }
 0x1b2   :  { %v86_v58 = vrot.slane %v78_v54, %v81_v46  ;;  %v104_v59 = vcvt.f32.s32 %v103_v56 }
 0x1b4   :  { %v107_v60 = vadd.s32 %v106_v55, %v104_v59  ;;  %v88_v61 = vsel %vm87_vm7, %v86_v58, %v82_v52 }
 0x1b5   :  { %v118_v62 = vpop.xlane.xlu1 %117  ;;  %90 = vst.msk [vmem:[#allocation6] sm:$0x3] %vm89_vm8, %v88_v61 }
 0x1b6   :  { %v126_v0 = vrot.slane %v107_v60, %v81_v46  ;;  %v119_v1 = vcvt.f32.s32 %v118_v62 }
 0x1b7   :  { %236 = shalt.err (!%p233_p0)
}
 0x1b8   :  { %154 = dma.vmem_to_hbm [thread:$0]  %s152_s28, 32, %s346_s3, [#allocation7]   ;;  %v122_v2 = vadd.s32 %v121_v63, %v119_v1 }
 0x1b9   :  { %s277_s5 = smov [#allocation8]  }
 0x1ba   :  { %s161_s6 = sshll.u32 %s277_s5, 4  ;;  %v130_v3 = vrot.slane %v122_v2, %v81_v46  ;;  %s162_s6 = int_to_ptr.vmem [resolvable:$true] %s161_s6 }
 0x1bb   :  { %s245_s7 = scalar_lea.vmem %s162_s6, 32  ;;  %p250_p2 = scmp.lt.s32.totalorder %s162_s6, %s162_s6 }
 0x1bc   :  { %v131_v4 = vsel %vm87_vm7, %v130_v3, %v126_v0  ;;  %p246_p1 = scmp.ne.s32.totalorder %s162_s6, %s245_s7  ;;  %p251_p3 = scmp.lt.s32.totalorder %s245_s7, %s245_s7 }
 0x1bd   :  { %132 = vst.msk [vmem:[#allocation8] sm:$0x3] %vm89_vm8, %v131_v4 }
 0x1be   :  { %p252_p4 = por %p251_p3, %p250_p2 }
 0x1c0   :  { %p253_p5 = pnand %p252_p4, %p246_p1 }
 0x1c2   :  { %256 = shalt.err (!%p253_p5)
}
 0x1c3   :  { %164 = dma.vmem_to_hbm [thread:$0]  %s162_s6, 32, %s347_s4, [#allocation7]  }
 0x1c4   :  { %267 = dma.done.wait [#allocation4], 256  }
 0x1c5   :  { %268 = vsyncadd [#allocation4], 4294967040 }
 0x1c6   :  { %269 = dma.done.wait [#allocation7], 64  }
 0x1c7   :  { %270 = vsyncadd [#allocation7], 4294967232 }
 0x1c8   :  { %174 = vsyncpa [#allocation3], 1 }
 0x1c9   :  { %175 = vsyncpa [#allocation4], 1 }
 0x1ca   :  { %176 = vsyncpa [#allocation7], 1 }

</bundles_post_ra>
